<compile_context>
chip_gen: v5e
topology: v5e:2x2
jax: 0.10.0
libtpu: 0.0.40
codegen_flags: <defaults>
</compile_context>

<pallas_src>
import functools

import jax
import jax.numpy as jnp
from jax.experimental import pallas as pl
from jax.experimental.pallas import tpu as pltpu


def ordnet_kernel(C, HW, x_ref, w1t_ref, b1_ref, w2_ref, b2_ref,
                  w3c_ref, b3_ref, obias_ref, o_ref, acc_ref):
    """Grid = (B, n_spatial_tiles).  Column-vector feature layout [F, ...]."""
    t = pl.program_id(1)
    n_t = pl.num_programs(1)

    # ---- zero the per-batch pooling accumulator at the first spatial tile ----
    @pl.when(t == 0)
    def _():
        acc_ref[...] = jnp.zeros_like(acc_ref)

    x = x_ref[0]                      # [C, T]   (spatial on lanes: lane-dense)
    w1t = w1t_ref[...]                # [F, C]
    T = x.shape[-1]

    # ---- feature extraction: 1x1 conv as C broadcast-FMAs on the VPU + ReLU
    # (C is tiny, so this avoids a nearly-empty MXU contraction).
    feat = b1_ref[...] + w1t[:, 0:1] * x[0:1, :]          # [F, T]
    for c in range(1, C):
        feat = feat + w1t[:, c:c + 1] * x[c:c + 1, :]
    feat = jnp.maximum(feat, 0.0)                          # [F, T]

    # ---- GlobalPooling(): running sum over spatial tiles (lane-axis reduce) ----
    acc_ref[...] += jnp.sum(feat, axis=-1, keepdims=True)  # [F, 1]

    # ---- classification head: run once, at the last spatial tile ----
    @pl.when(t == n_t - 1)
    def _():
        pooled = acc_ref[...] * (1.0 / HW)                 # [F, 1]  spatial mean
        # Linear(F, F) + ReLU   (torch layout W:[out,in] -> column form W @ x)
        h = jnp.dot(w2_ref[...], pooled,
                    preferred_element_type=jnp.float32) + b2_ref[...]
        h = jnp.maximum(h, 0.0)                            # [F, 1]
        # Linear(F, 1): sublane reduce of w3 (stored as a column) against h
        p = jnp.sum(w3c_ref[...] * h, axis=0, keepdims=True) + b3_ref[...]  # [1,1]
        # ordinal head: sigmoid(p_general + bias) broadcast to [1, K-1]
        o_ref[0] = jax.nn.sigmoid(p + obias_ref[...])


def _pick_spatial_tile(hw, max_tile=1024):
    """Largest lane-dense (multiple-of-128) tile <= max_tile that divides HW."""
    if hw % 128 != 0:
        return hw                      # fall back to a full-spatial block
    t = 128
    while t * 2 <= min(hw, max_tile) and hw % (t * 2) == 0:
        t *= 2
    return t


def ordnet_forward(x_nchw, params, n_classes):
    B, C, H, W = x_nchw.shape
    HW = H * W
    w1t, b1, w2, b2, w3c, b3, obias = params
    F = w1t.shape[0]
    K1 = n_classes - 1

    # channels-first, spatial flattened: free reshape, NO transpose pass.
    x = x_nchw.reshape(B, C, HW)

    t_hw = _pick_spatial_tile(HW)
    n_t = HW // t_hw

    kernel = functools.partial(ordnet_kernel, C, HW)

    grid_spec = pltpu.PrefetchScalarGridSpec(
        num_scalar_prefetch=0,
        grid=(B, n_t),
        in_specs=[
            pl.BlockSpec((1, C, t_hw), lambda b, t: (b, 0, t)),  # X tile
            pl.BlockSpec((F, C), lambda b, t: (0, 0)),           # w1^T
            pl.BlockSpec((F, 1), lambda b, t: (0, 0)),           # b1
            pl.BlockSpec((F, F), lambda b, t: (0, 0)),           # w2 (out,in)
            pl.BlockSpec((F, 1), lambda b, t: (0, 0)),           # b2
            pl.BlockSpec((F, 1), lambda b, t: (0, 0)),           # w3 (column)
            pl.BlockSpec((1, 1), lambda b, t: (0, 0)),           # b3
            pl.BlockSpec((1, K1), lambda b, t: (0, 0)),          # ordinal bias
        ],
        out_specs=pl.BlockSpec((1, 1, K1), lambda b, t: (b, 0, 0)),
        scratch_shapes=[pltpu.VMEM((F, 1), jnp.float32)],        # pool accumulator
    )

    param_bytes = sum(int(p.size) * p.dtype.itemsize for p in params)
    cost = pl.CostEstimate(
        flops=2 * B * HW * C * F + B * HW * F + 2 * B * F * F + 2 * B * F,
        transcendentals=B * K1,
        bytes_accessed=int(x.size) * x.dtype.itemsize + param_bytes + B * K1 * 4,
    )

    out = pl.pallas_call(
        kernel,
        out_shape=jax.ShapeDtypeStruct((B, 1, K1), jnp.float32),
        grid_spec=grid_spec,
        compiler_params=pltpu.CompilerParams(
            dimension_semantics=("parallel", "arbitrary")),
        cost_estimate=cost,
    )(x, w1t, b1, w2, b2, w3c, b3, obias)

    return out.reshape(B, K1)


def ordnet_reference(x_nchw, params, n_classes):
    """Pure-JAX reference of the same forward pass."""
    w1t, b1, w2, b2, w3c, b3, obias = params
    B, C, H, W = x_nchw.shape
    x = x_nchw.reshape(B, C, H * W)
    feat = jnp.maximum(jnp.einsum('fc,bcs->bfs', w1t, x) + b1[None, :, :], 0.0)
    pooled = jnp.mean(feat, axis=-1)                          # [B, F]
    h = jnp.maximum(pooled @ w2.T + b2[:, 0][None, :], 0.0)   # [B, F]
    p = h @ w3c + b3[0]                                       # [B, 1]
    return jax.nn.sigmoid(p + obias)                          # [B, K-1]


def init_params(key, n_channels, last_size, n_classes):
    k1, k2, k3 = jax.random.split(key, 3)
    # feature extraction: 1x1 conv  C -> F   (stored as [F, C] = W^T of [C, F])
    w1t = 0.1 * jax.random.normal(k1, (last_size, n_channels), jnp.float32)
    b1 = jnp.zeros((last_size, 1), jnp.float32)
    # classification head: Linear(F, F) in torch [out, in] layout, Linear(F, 1)
    w2 = 0.1 * jax.random.normal(k2, (last_size, last_size), jnp.float32)
    b2 = jnp.zeros((last_size, 1), jnp.float32)
    w3c = 0.1 * jax.random.normal(k3, (last_size, 1), jnp.float32)  # [F, 1]
    b3 = jnp.zeros((1, 1), jnp.float32)
    # OrdNet ordinal bias: torch.zeros([1, n_classes - 1])
    obias = jnp.zeros((1, n_classes - 1), jnp.float32)
    return (w1t, b1, w2, b2, w3c, b3, obias)


if __name__ == "__main__":
    B, C, H, W = 2, 4, 32, 32      # spatial_dimensions=2, n_channels=4
    last_size = 32                 # feature channels ("last_size")
    n_classes = 4                  # ordinal output has n_classes - 1 = 3 logits

    key = jax.random.PRNGKey(0)
    kx, kp = jax.random.split(key)
    x = jax.random.normal(kx, (B, C, H, W), jnp.float32)
    params = init_params(kp, C, last_size, n_classes)

    out = ordnet_forward(x, params, n_classes)
    out = jax.block_until_ready(out)

    assert out.shape == (B, n_classes - 1)
    assert bool(jnp.all(jnp.isfinite(out)))
    assert bool(jnp.all((out >= 0.0) & (out <= 1.0)))

    ref = ordnet_reference(x, params, n_classes)
    assert bool(jnp.allclose(out, ref, atol=1e-4, rtol=1e-4))

    print("KERNEL_OK")
</pallas_src>

<mosaic_0001>
module attributes {stable_mosaic.version = 11 : i64} {
  func.func @ordnet_kernel(%arg0: i32, %arg1: i32, %arg2: memref<1x4x1024xf32, #tpu.memory_space<vmem>>, %arg3: memref<32x4xf32, #tpu.memory_space<vmem>>, %arg4: memref<32x1xf32, #tpu.memory_space<vmem>>, %arg5: memref<32x32xf32, #tpu.memory_space<vmem>>, %arg6: memref<32x1xf32, #tpu.memory_space<vmem>>, %arg7: memref<32x1xf32, #tpu.memory_space<vmem>>, %arg8: memref<1x1xf32, #tpu.memory_space<vmem>>, %arg9: memref<1x3xf32, #tpu.memory_space<vmem>>, %arg10: memref<1x1x3xf32, #tpu.memory_space<vmem>>, %arg11: memref<32x1xf32, #tpu.memory_space<vmem>>) attributes {dimension_semantics = [#tpu.dimension_semantics<parallel>, #tpu.dimension_semantics<arbitrary>], iteration_bounds = array<i64: 2, 1>, scalar_prefetch = 0 : i64, scratch_operands = 1 : i64, tpu.core_type = #tpu.core_type<tc>, window_params = [{transform_indices = @transform_0, window_bounds = array<i64: 1, 4, 1024>}, {pipeline_mode = #tpu.pipeline_mode<synchronous>, transform_indices = @transform_1, window_bounds = array<i64: 32, 4>}, {pipeline_mode = #tpu.pipeline_mode<synchronous>, transform_indices = @transform_2, window_bounds = array<i64: 32, 1>}, {pipeline_mode = #tpu.pipeline_mode<synchronous>, transform_indices = @transform_3, window_bounds = array<i64: 32, 32>}, {pipeline_mode = #tpu.pipeline_mode<synchronous>, transform_indices = @transform_4, window_bounds = array<i64: 32, 1>}, {pipeline_mode = #tpu.pipeline_mode<synchronous>, transform_indices = @transform_5, window_bounds = array<i64: 32, 1>}, {pipeline_mode = #tpu.pipeline_mode<synchronous>, transform_indices = @transform_6, window_bounds = array<i64: 1, 1>}, {pipeline_mode = #tpu.pipeline_mode<synchronous>, transform_indices = @transform_7, window_bounds = array<i64: 1, 3>}, {transform_indices = @transform_8, window_bounds = array<i64: 1, 1, 3>}]} {
    %c0_i32 = arith.constant 0 : i32
    %0 = arith.cmpi eq, %arg1, %c0_i32 : i32
    %1 = arith.extui %0 : i1 to i32
    %c0_i32_0 = arith.constant 0 : i32
    %2 = arith.cmpi ne, %1, %c0_i32_0 : i32
    scf.if %2 {
      %cst_14 = arith.constant 0.000000e+00 : f32
      %42 = vector.broadcast %cst_14 : f32 to vector<32x1xf32>
      %c0_15 = arith.constant 0 : index
      %c0_16 = arith.constant 0 : index
      %43 = vector.load %arg11[%c0_15, %c0_16] : memref<32x1xf32, #tpu.memory_space<vmem>>, vector<32x1xf32>
      tpu.vector_store %arg11[%c0_15, %c0_16], %42 {strides = array<i32>} : memref<32x1xf32, #tpu.memory_space<vmem>>, vector<32x1xf32>,
    } else {
    }
    %c0 = arith.constant 0 : index
    %c0_1 = arith.constant 0 : index
    %c0_2 = arith.constant 0 : index
    %3 = vector.load %arg2[%c0, %c0_1, %c0_2] : memref<1x4x1024xf32, #tpu.memory_space<vmem>>, vector<1x4x1024xf32>
    %4 = vector.shape_cast %3 : vector<1x4x1024xf32> to vector<4x1024xf32>
    %c0_3 = arith.constant 0 : index
    %c0_4 = arith.constant 0 : index
    %5 = vector.load %arg3[%c0_3, %c0_4] : memref<32x4xf32, #tpu.memory_space<vmem>>, vector<32x4xf32>
    %c0_5 = arith.constant 0 : index
    %c0_6 = arith.constant 0 : index
    %6 = vector.load %arg4[%c0_5, %c0_6] : memref<32x1xf32, #tpu.memory_space<vmem>>, vector<32x1xf32>
    %7 = vector.extract_strided_slice %5 {offsets = [0, 0], sizes = [32, 1], strides = [1, 1]} : vector<32x4xf32> to vector<32x1xf32>
    %8 = vector.extract_strided_slice %4 {offsets = [0, 0], sizes = [1, 1024], strides = [1, 1]} : vector<4x1024xf32> to vector<1x1024xf32>
    %9 = vector.broadcast %7 : vector<32x1xf32> to vector<32x1024xf32>
    %10 = vector.broadcast %8 : vector<1x1024xf32> to vector<32x1024xf32>
    %11 = arith.mulf %9, %10 : vector<32x1024xf32>
    %12 = vector.broadcast %6 : vector<32x1xf32> to vector<32x1024xf32>
    %13 = arith.addf %12, %11 : vector<32x1024xf32>
    %14 = vector.extract_strided_slice %5 {offsets = [0, 1], sizes = [32, 1], strides = [1, 1]} : vector<32x4xf32> to vector<32x1xf32>
    %15 = vector.extract_strided_slice %4 {offsets = [1, 0], sizes = [1, 1024], strides = [1, 1]} : vector<4x1024xf32> to vector<1x1024xf32>
    %16 = vector.broadcast %14 : vector<32x1xf32> to vector<32x1024xf32>
    %17 = vector.broadcast %15 : vector<1x1024xf32> to vector<32x1024xf32>
    %18 = arith.mulf %16, %17 : vector<32x1024xf32>
    %19 = arith.addf %13, %18 : vector<32x1024xf32>
    %20 = vector.extract_strided_slice %5 {offsets = [0, 2], sizes = [32, 1], strides = [1, 1]} : vector<32x4xf32> to vector<32x1xf32>
    %21 = vector.extract_strided_slice %4 {offsets = [2, 0], sizes = [1, 1024], strides = [1, 1]} : vector<4x1024xf32> to vector<1x1024xf32>
    %22 = vector.broadcast %20 : vector<32x1xf32> to vector<32x1024xf32>
    %23 = vector.broadcast %21 : vector<1x1024xf32> to vector<32x1024xf32>
    %24 = arith.mulf %22, %23 : vector<32x1024xf32>
    %25 = arith.addf %19, %24 : vector<32x1024xf32>
    %26 = vector.extract_strided_slice %5 {offsets = [0, 3], sizes = [32, 1], strides = [1, 1]} : vector<32x4xf32> to vector<32x1xf32>
    %27 = vector.extract_strided_slice %4 {offsets = [3, 0], sizes = [1, 1024], strides = [1, 1]} : vector<4x1024xf32> to vector<1x1024xf32>
    %28 = vector.broadcast %26 : vector<32x1xf32> to vector<32x1024xf32>
    %29 = vector.broadcast %27 : vector<1x1024xf32> to vector<32x1024xf32>
    %30 = arith.mulf %28, %29 : vector<32x1024xf32>
    %31 = arith.addf %25, %30 : vector<32x1024xf32>
    %cst = arith.constant 0.000000e+00 : f32
    %32 = vector.broadcast %cst : f32 to vector<32x1024xf32>
    %33 = arith.maximumf %31, %32 : vector<32x1024xf32>
    %c0_7 = arith.constant 0 : index
    %c0_8 = arith.constant 0 : index
    %34 = vector.load %arg11[%c0_7, %c0_8] : memref<32x1xf32, #tpu.memory_space<vmem>>, vector<32x1xf32>
    %cst_9 = arith.constant dense<0.000000e+00> : vector<32xf32>
    %35 = vector.multi_reduction <add>, %33, %cst_9 [1] : vector<32x1024xf32> to vector<32xf32>
    %36 = vector.shape_cast %35 : vector<32xf32> to vector<32x1xf32>
    %37 = arith.addf %34, %36 : vector<32x1xf32>
    %c0_10 = arith.constant 0 : index
    %c0_11 = arith.constant 0 : index
    %38 = vector.load %arg11[%c0_10, %c0_11] : memref<32x1xf32, #tpu.memory_space<vmem>>, vector<32x1xf32>
    tpu.vector_store %arg11[%c0_10, %c0_11], %37 {strides = array<i32>} : memref<32x1xf32, #tpu.memory_space<vmem>>, vector<32x1xf32>,
    %c0_i32_12 = arith.constant 0 : i32
    %39 = arith.cmpi eq, %arg1, %c0_i32_12 : i32
    %40 = arith.extui %39 : i1 to i32
    %c0_i32_13 = arith.constant 0 : i32
    %41 = arith.cmpi ne, %40, %c0_i32_13 : i32
    scf.if %41 {
      %c0_14 = arith.constant 0 : index
      %c0_15 = arith.constant 0 : index
      %42 = vector.load %arg11[%c0_14, %c0_15] : memref<32x1xf32, #tpu.memory_space<vmem>>, vector<32x1xf32>
      %cst_16 = arith.constant 9.765625E-4 : f32
      %43 = vector.broadcast %cst_16 : f32 to vector<32x1xf32>
      %44 = arith.mulf %42, %43 : vector<32x1xf32>
      %c0_17 = arith.constant 0 : index
      %c0_18 = arith.constant 0 : index
      %45 = vector.load %arg5[%c0_17, %c0_18] : memref<32x32xf32, #tpu.memory_space<vmem>>, vector<32x32xf32>
      %cst_19 = arith.constant dense<0.000000e+00> : vector<32x1xf32>
      %46 = tpu.matmul %45, %44, %cst_19 {dimension_numbers = #tpu.dot_dimension_numbers<[1], [0], [0], [1], [0, 0, 1, 1], [], []>} : vector<32x32xf32>, vector<32x1xf32>, vector<32x1xf32> -> vector<32x1xf32>
      %c0_20 = arith.constant 0 : index
      %c0_21 = arith.constant 0 : index
      %47 = vector.load %arg6[%c0_20, %c0_21] : memref<32x1xf32, #tpu.memory_space<vmem>>, vector<32x1xf32>
      %48 = arith.addf %46, %47 : vector<32x1xf32>
      %cst_22 = arith.constant 0.000000e+00 : f32
      %49 = vector.broadcast %cst_22 : f32 to vector<32x1xf32>
      %50 = arith.maximumf %48, %49 : vector<32x1xf32>
      %c0_23 = arith.constant 0 : index
      %c0_24 = arith.constant 0 : index
      %51 = vector.load %arg7[%c0_23, %c0_24] : memref<32x1xf32, #tpu.memory_space<vmem>>, vector<32x1xf32>
      %52 = arith.mulf %51, %50 : vector<32x1xf32>
      %cst_25 = arith.constant dense<0.000000e+00> : vector<1xf32>
      %53 = vector.multi_reduction <add>, %52, %cst_25 [0] : vector<32x1xf32> to vector<1xf32>
      %54 = vector.shape_cast %53 : vector<1xf32> to vector<1x1xf32>
      %c0_26 = arith.constant 0 : index
      %c0_27 = arith.constant 0 : index
      %55 = vector.load %arg8[%c0_26, %c0_27] : memref<1x1xf32, #tpu.memory_space<vmem>>, vector<1x1xf32>
      %56 = arith.addf %54, %55 : vector<1x1xf32>
      %c0_28 = arith.constant 0 : index
      %c0_29 = arith.constant 0 : index
      %57 = vector.load %arg9[%c0_28, %c0_29] : memref<1x3xf32, #tpu.memory_space<vmem>>, vector<1x3xf32>
      %58 = vector.broadcast %56 : vector<1x1xf32> to vector<1x3xf32>
      %59 = arith.addf %58, %57 : vector<1x3xf32>
      %60 = arith.negf %59 : vector<1x3xf32>
      %61 = math.exp %60 : vector<1x3xf32>
      %cst_30 = arith.constant 1.000000e+00 : f32
      %62 = vector.broadcast %cst_30 : f32 to vector<1x3xf32>
      %63 = arith.addf %62, %61 : vector<1x3xf32>
      %64 = arith.divf %62, %63 : vector<1x3xf32>
      %c0_31 = arith.constant 0 : index
      %c0_32 = arith.constant 0 : index
      %c0_33 = arith.constant 0 : index
      %65 = vector.load %arg10[%c0_31, %c0_32, %c0_33] : memref<1x1x3xf32, #tpu.memory_space<vmem>>, vector<1x1x3xf32>
      %66 = vector.shape_cast %65 : vector<1x1x3xf32> to vector<1x3xf32>
      %67 = vector.shape_cast %64 : vector<1x3xf32> to vector<1x1x3xf32>
      tpu.vector_store %arg10[%c0_31, %c0_32, %c0_33], %67 {strides = array<i32>} : memref<1x1x3xf32, #tpu.memory_space<vmem>>, vector<1x1x3xf32>,
    } else {
    }
    return
  }
  func.func @transform_0(%arg0: i32, %arg1: i32) -> (i32, i32, i32) {
    %c0_i32 = arith.constant 0 : i32
    %c0_i32_0 = arith.constant 0 : i32
    return %arg0, %c0_i32, %arg1 : i32, i32, i32
  }
  func.func @transform_1(%arg0: i32, %arg1: i32) -> (i32, i32) {
    %c0_i32 = arith.constant 0 : i32
    %c0_i32_0 = arith.constant 0 : i32
    %c0_i32_1 = arith.constant 0 : i32
    return %c0_i32, %c0_i32_0 : i32, i32
  }
  func.func @transform_2(%arg0: i32, %arg1: i32) -> (i32, i32) {
    %c0_i32 = arith.constant 0 : i32
    %c0_i32_0 = arith.constant 0 : i32
    %c0_i32_1 = arith.constant 0 : i32
    return %c0_i32, %c0_i32_0 : i32, i32
  }
  func.func @transform_3(%arg0: i32, %arg1: i32) -> (i32, i32) {
    %c0_i32 = arith.constant 0 : i32
    %c0_i32_0 = arith.constant 0 : i32
    %c0_i32_1 = arith.constant 0 : i32
    return %c0_i32, %c0_i32_0 : i32, i32
  }
  func.func @transform_4(%arg0: i32, %arg1: i32) -> (i32, i32) {
    %c0_i32 = arith.constant 0 : i32
    %c0_i32_0 = arith.constant 0 : i32
    %c0_i32_1 = arith.constant 0 : i32
    return %c0_i32, %c0_i32_0 : i32, i32
  }
  func.func @transform_5(%arg0: i32, %arg1: i32) -> (i32, i32) {
    %c0_i32 = arith.constant 0 : i32
    %c0_i32_0 = arith.constant 0 : i32
    %c0_i32_1 = arith.constant 0 : i32
    return %c0_i32, %c0_i32_0 : i32, i32
  }
  func.func @transform_6(%arg0: i32, %arg1: i32) -> (i32, i32) {
    %c0_i32 = arith.constant 0 : i32
    %c0_i32_0 = arith.constant 0 : i32
    %c0_i32_1 = arith.constant 0 : i32
    return %c0_i32, %c0_i32_0 : i32, i32
  }
  func.func @transform_7(%arg0: i32, %arg1: i32) -> (i32, i32) {
    %c0_i32 = arith.constant 0 : i32
    %c0_i32_0 = arith.constant 0 : i32
    %c0_i32_1 = arith.constant 0 : i32
    return %c0_i32, %c0_i32_0 : i32, i32
  }
  func.func @transform_8(%arg0: i32, %arg1: i32) -> (i32, i32, i32) {
    %c0_i32 = arith.constant 0 : i32
    %c0_i32_0 = arith.constant 0 : i32
    %c0_i32_1 = arith.constant 0 : i32
    return %arg0, %c0_i32, %c0_i32_0 : i32, i32, i32
  }
}

</mosaic_0001>

<bundles_post_ra>
// kernel: tpu_custom_call.1
= control target key start
LH: loop header
LB: loop body
LE: loop exit
PB: predicated region body
PF: predicated region fallthrough
CT: control target
= control target key end

     0   :  { %s1958_s0 = inlined_call_operand.vmem [shape: f32[2,4,1024], index: 0, kind: input, shape index: {}]   ;;  %s1959_s1 = inlined_call_operand.vmem [shape: f32[32,4], index: 1, kind: input, shape index: {}]   ;;  %s1960_s2 = inlined_call_operand.vmem [shape: f32[32,1], index: 2, kind: input, shape index: {}]   ;;  %s1961_s3 = inlined_call_operand.vmem [shape: f32[32,32], index: 3, kind: input, shape index: {}]   ;;  %s1962_s4 = inlined_call_operand.vmem [shape: f32[32,1], index: 4, kind: input, shape index: {}]   ;;  %s1963_s5 = inlined_call_operand.vmem [shape: f32[32,1], index: 5, kind: input, shape index: {}]   ;;  %s1964_s6 = inlined_call_operand.<no memory space> [shape: f32[1,1], index: 6, kind: input, shape index: {}]   ;;  %s1965_s7 = inlined_call_operand.vmem [shape: f32[1,3], index: 7, kind: input, shape index: {}]   ;;  %s1966_s8 = inlined_call_operand.hbm [shape: f32[2,1,3], index: 8, kind: output, shape index: {}]  }
   0x1   :  { %v13_v0 = vstv %s1964_s6 }
   0x2   :  { %14 = vst [vmem:[#allocation3] sm:$0x1] %v13_v0 }
   0x3   :  { %15 = vsyncpa [#allocation5], 0 }
   0x4   :  { %17 = vsyncpa [#allocation5 + $0x1], 0  ;;  %s1320_s29 = smov 0   ;;  %s1322_s30 = smov 0  }
   0x5   :  { %s1324_s9 = smov 0   ;;  %s1326_s10 = smov 0  }
   0x6   :  { %s1328_s11 = smov 0   ;;  %s1330_s12 = smov 0  }
   0x7 LB: > { %s1077_s6 = sadd.s32 4294967295, %s1265_s12   ;;  %s1078_s13 = sadd.s32 4294967294, %s1265_s12   ;;  %s1265_s12 = sphi %s1330_s12, %s23_s12   ;;  %s1261_s11 = sphi %s1328_s11, %s2078_s11   ;;  %s1257_s10 = sphi %s1326_s10, %s2077_s10   ;;  %s1253_s9 = sphi %s1324_s9, %s2076_s9   ;;  %s1249_s30 = sphi %s1322_s30, %s2075_s30   ;;  %s1245_s29 = sphi %s1320_s29, %s2074_s29  }
   0x8   : > { %s35_s14 = sadd.s32 1, %s1261_s11  ;;  %s217_s15 = sadd.s32 1, %s1253_s9 }
   0x9   : > { %p37_p0 = scmp.ge.s32.totalorder %s35_s14, 2  ;;  %p227_p1 = scmp.ne.s32.totalorder %s1253_s9, %s1249_s30 }
   0xa   : > { %p228_p2 = scmp.eq.s32.totalorder %s1077_s6, 1  ;;  %p233_p3 = scmp.ne.s32.totalorder %s1249_s30, %s1245_s29 }
   0xb   : > { %s2080_s14 = smov (%p37_p0, %s35_s14), 0  ;;  %p234_p5 = scmp.eq.s32.totalorder %s1078_s13, 1 }
   0xc   : > { %p1360_p4 = por %p228_p2, %p227_p1  ;;  %s214_s17 = ssub.s32 %s1261_s11, %s2080_s14 }
   0xd   : > { %p1081_p6 = scmp.ge.s32.totalorder %s1265_s12, 1  ;;  %p215_p7 = scmp.eq.s32.totalorder %s214_s17, 0 }
   0xe   : > { %p1367_p8 = por %p234_p5, %p233_p3  ;;  %p286_p9 = scmp.lt.s32.totalorder %s1265_s12, 3 }
   0xf   : > { %s1373_s19 = scalar_select %p215_p7, %s1253_s9, %s217_s15  }
  0x10   : > { %p287_p10 = pnand %p1081_p6, %p286_p9 }
  0x12   : > { %290 = sbr.rel (%p287_p10) target bundleno = 642 (0x282), region = 52 }
  0x17   : > { %v353_v1 = vld [vmem:[%s1960_s2 + $0x18] sm:$0xff]  ;;  %v347_v3 = vld [vmem:[%s1959_s1 + $0x8] sm:$0xff]  ;;  %v1267_v4 = vmov 0   ;;  %v348_v5 = vld [vmem:[%s1959_s1 + $0x10] sm:$0xff]  ;;  %v1268_v7 = vmov 1   ;;  %v1269_v9 = vmov 2   ;;  %s1004_s15 = scalar_lea.hbm %s1966_s8, %s1257_s10 }
  0x18   : > { %v349_v2 = vld [vmem:[%s1959_s1 + $0x18] sm:$0xff]  ;;  %1165 = vset.pattern.permute.xlu1 %v1267_v4  ;;  %1164 = vset.pattern.permute.xlu0 %v1267_v4  ;;  %v352_v6 = vld [vmem:[%s1960_s2 + $0x10] sm:$0xff]  ;;  %v346_v8 = vld [vmem:[%s1959_s1] sm:$0xff]  ;;  %v1270_v12 = vmov 3   ;;  %p324_p11 = scmp.lt.s32.totalorder %s1257_s10, 1  ;;  %vm337_vm0 = vcmask 7168  }
  0x19   : > { %1167 = vset.pattern.permute.xlu2 %v1267_v4  ;;  %451 = vperm.xlu1 %1165, %v353_v1   ;;  %v351_v10 = vld [vmem:[%s1960_s2 + $0x8] sm:$0xff]  ;;  %v350_v11 = vld [vmem:[%s1960_s2] sm:$0xff]  ;;  %vm898_vm1 = vcmask 261120   ;;  %s321_s28 = sand.u32 1, %s1249_s30   ;;  %s1008_s21 = sshll.u32 %s1004_s15, 4  ;;  %vm993_vm5 = vcmask 16384   ;;  %s1009_s21 = int_to_ptr.hbm [resolvable:$true] %s1008_s21 }
  0x1a   : > { %371 = vperm.xlu0 %1164, %v349_v2   ;;  %361 = vperm.xlu2 %1167, %v347_v3   ;;  %s325_s23 = scalar_select %p324_p11, %s1257_s10, 1 }
  0x1b   : > { %s322_s17 = scalar_lea.vmem [#allocation4], %s321_s28  ;;  %s996_s10 = scalar_lea.sflag [#allocation5], %s321_s28 }
  0x1c   : > { %s1091_s24 = sshll.u32 %s325_s23, 5  ;;  %s1006_s20 = sshll.u32 %s322_s17, 4  ;;  %s1007_s20 = int_to_ptr.vmem [resolvable:$true] %s1006_s20 }
  0x1d   : > { %s331_s27 = scalar_lea.vmem %s1958_s0, %s1091_s24  ;;  %s1201_s22 = sshra.s32 %s1009_s21, 4  ;;  %s1202_s22 = int_to_ptr.hbm [resolvable:$true] %s1201_s22 }
  0x1e   : > { %v1404_v14 = vld [vmem:[%s331_s27] sm:$0xff]  ;;  %v1406_v15 = vld [vmem:[%s331_s27 + $0x8] sm:$0xff]  ;;  %v1408_v16 = vld [vmem:[%s331_s27 + $0x10] sm:$0xff]  ;;  %s1203_s23 = scalar_lea.hbm %s1202_s22, 1  ;;  %s1207_s26 = scalar_lea.hbm %s1966_s8, 2 }
  0x1f   : > { %v1410_v17 = vld [vmem:[%s331_s27 + $0x18] sm:$0xff]  ;;  %v378_v18 = vperm.slane %v1404_v14, 0  ;;  %v379_v20 = vperm.slane %v1404_v14, 4  ;;  %v380_v21 = vperm.slane %v1406_v15, 0  ;;  %v381_v22 = vperm.slane %v1406_v15, 4  ;;  %p1204_p12 = scmp.ne.s32.totalorder %s1202_s22, %s1203_s23  ;;  %p1208_p1 = scmp.lt.s32.totalorder %s1202_s22, %s1966_s8 }
  0x20   : > { %v382_v23 = vperm.slane %v1408_v16, 0  ;;  %v383_v24 = vperm.slane %v1408_v16, 4  ;;  %v384_v25 = vperm.slane %v1410_v17, 0  ;;  %v385_v26 = vperm.slane %v1410_v17, 4  ;;  %p1209_p2 = scmp.lt.s32.totalorder %s1207_s26, %s1203_s23 }
  0x21   : > { %1166 = vset.pattern.permute.xlu1 %v1268_v7  ;;  %v502_v27 = vperm.slane %v1404_v14, 1  ;;  %v503_v28 = vperm.slane %v1404_v14, 5  ;;  %v504_v29 = vperm.slane %v1406_v15, 1  ;;  %v1425_v30 = vperm.slane %v378_v18, 0  ;;  %p1205_p13 = pnand %p1204_p12, %p1360_p4 }
  0x22   : > { %366 = vperm.xlu0 %1164, %v348_v5   ;;  %499 = vperm.xlu1 %1166, %v349_v2   ;;  %v1427_v31 = vperm.slane %v379_v20, 0  ;;  %v1429_v32 = vperm.slane %v380_v21, 0  ;;  %v1431_v33 = vperm.slane %v381_v22, 0  ;;  %v505_v34 = vperm.slane %v1406_v15, 5  ;;  %p1210_p3 = por %p1209_p2, %p1208_p1 }
  0x23   : > { %446 = vperm.xlu2 %1167, %v352_v6   ;;  %v1434_v35 = vperm.slane %v382_v23, 0  ;;  %v1436_v36 = vperm.slane %v383_v24, 0  ;;  %v1438_v37 = vperm.slane %v384_v25, 0  ;;  %v1440_v38 = vperm.slane %v385_v26, 0  ;;  %p1206_p0 = pneg %p1205_p13 }
  0x24   : > { %v1442_v39 = vperm.slane %v502_v27, 1  ;;  %v1444_v40 = vperm.slane %v503_v28, 1  ;;  %v1446_v41 = vperm.slane %v504_v29, 1  ;;  %v506_v42 = vperm.slane %v1408_v16, 1 }
  0x25   : > { %1992 = vst [vmem:[#allocation7_spill] sm:$0xff] %v1436_v36  ;;  %v507_v45 = vperm.slane %v1408_v16, 5  ;;  %v508_v46 = vperm.slane %v1410_v17, 1  ;;  %v509_v47 = vperm.slane %v1410_v17, 5  ;;  %v1466_v51 = vperm.slane %v505_v34, 1  ;;  %p1211_p5 = pnand %p1210_p3, %p1206_p0 }
  0x26   : > { %1993 = vst [vmem:[#allocation8_spill] sm:$0xff] %v1438_v37  ;;  %v606_v52 = vperm.slane %v1404_v14, 2  ;;  %v607_v53 = vperm.slane %v1404_v14, 6  ;;  %v608_v54 = vperm.slane %v1406_v15, 2  ;;  %v609_v55 = vperm.slane %v1406_v15, 6 }
  0x27   : > { %1994 = vst [vmem:[#allocation9_spill] sm:$0xff] %v1440_v38  ;;  %v610_v56 = vperm.slane %v1408_v16, 2  ;;  %v611_v57 = vperm.slane %v1408_v16, 6  ;;  %v612_v58 = vperm.slane %v1410_v17, 2  ;;  %v613_v59 = vperm.slane %v1410_v17, 6 }
  0x28   : > { %1995 = vst [vmem:[#allocation10_spill] sm:$0xff] %v1442_v39  ;;  %v1479_v61 = vperm.slane %v506_v42, 1  ;;  %v1481_v62 = vperm.slane %v507_v45, 1  ;;  %v1483_v63 = vperm.slane %v508_v46, 1  ;;  %v1500_v6 = vperm.slane %v607_v53, 2 }
  0x29   : > { %1996 = vst [vmem:[#allocation11_spill] sm:$0xff] %v1444_v40  ;;  %v710_v18 = vperm.slane %v1404_v14, 3  ;;  %v711_v20 = vperm.slane %v1404_v14, 7  ;;  %v712_v21 = vperm.slane %v1406_v15, 3  ;;  %v713_v22 = vperm.slane %v1406_v15, 7 }
  0x2a   : > { %1168 = vset.pattern.permute.xlu0 %v1268_v7  ;;  %1169 = vset.pattern.permute.xlu1 %v1269_v9  ;;  %1997 = vst [vmem:[#allocation12_spill] sm:$0xff] %v1446_v41  ;;  %v714_v23 = vperm.slane %v1408_v16, 3  ;;  %v715_v24 = vperm.slane %v1408_v16, 7  ;;  %v716_v25 = vperm.slane %v1410_v17, 3  ;;  %v717_v26 = vperm.slane %v1410_v17, 7 }
  0x2b   : > { %495 = vperm.xlu0 %1168, %v348_v5   ;;  %356 = vperm.xlu2 %1167, %v346_v8   ;;  %1999 = vst [vmem:[#allocation14_spill] sm:$0xff] %v1466_v51  ;;  %v1536_v45 = vperm.slane %v710_v18, 3  ;;  %v1538_v46 = vperm.slane %v711_v20, 3 }
  0x2c   : > { %603 = vperm.xlu1 %1169, %v349_v2   ;;  %2000 = vst [vmem:[#allocation15_spill] sm:$0xff] %v1479_v61  ;;  %v1544_v53 = vperm.slane %v714_v23, 3 }
  0x2d   : > { %2001 = vst [vmem:[#allocation16_spill] sm:$0xff] %v1481_v62 }
  0x2e   : > { %2002 = vst [vmem:[#allocation17_spill] sm:$0xff] %v1483_v63 }
  0x2f   : > { %2005 = vst [vmem:[#allocation20_spill] sm:$0xff] %v1536_v45 }
  0x30   : > { %2006 = vst [vmem:[#allocation21_spill] sm:$0xff] %v1538_v46 }
  0x31   : > { %2009 = vst [vmem:[#allocation24_spill] sm:$0xff] %v1544_v53 }
  0x33   : > { %1172 = vset.pattern.permute.xlu0 %v1269_v9  ;;  %1171 = vset.pattern.permute.xlu2 %v1268_v7 }
  0x34   : > { %1170 = vset.pattern.permute.xlu1 %v1267_v4  ;;  %599 = vperm.xlu0 %1172, %v348_v5  }
  0x35   : > { %491 = vperm.xlu2 %1171, %v347_v3   ;;  %441 = vperm.xlu1 %1170, %v351_v10   ;;  %v1506_v10 = vperm.slane %v610_v56, 2  ;;  %v1550_v56 = vperm.slane %v717_v26, 3 }
  0x37   : > { %2012 = vst [vmem:[#allocation27_spill] sm:$0xff] %v1550_v56 }
  0x3c   : > { %1177 = vset.pattern.permute.xlu0 %v1270_v12 }
  0x3d   : > { %1174 = vset.pattern.permute.xlu2 %v1267_v4  ;;  %1173 = vset.pattern.permute.xlu1 %v1270_v12 }
  0x3e   : > { %703 = vperm.xlu0 %1177, %v348_v5   ;;  %436 = vperm.xlu2 %1174, %v350_v11   ;;  %v1498_v5 = vperm.slane %v606_v52, 2  ;;  %v1508_v11 = vperm.slane %v611_v57, 2  ;;  %v1542_v52 = vperm.slane %v713_v22, 3 }
  0x3f   : > { %707 = vperm.xlu1 %1173, %v349_v2  }
  0x40   : > { %2008 = vst [vmem:[#allocation23_spill] sm:$0xff] %v1542_v52 }
  0x46   : > { %1176 = vset.pattern.permute.xlu2 %v1269_v9  ;;  %1182 = vset.pattern.permute.xlu0 %v1267_v4 }
  0x47   : > { %1175 = vset.pattern.permute.xlu1 %v1268_v7  ;;  %595 = vperm.xlu2 %1176, %v347_v3   ;;  %v1502_v7 = vperm.slane %v608_v54, 2  ;;  %v1546_v54 = vperm.slane %v715_v24, 3 }
  0x48   : > { %487 = vperm.xlu1 %1175, %v346_v8  }
  0x49   : > { %2010 = vst [vmem:[#allocation25_spill] sm:$0xff] %v1546_v54 }
  0x4f   : > { %1179 = vset.pattern.permute.xlu2 %v1270_v12 }
  0x50   : > { %1178 = vset.pattern.permute.xlu1 %v1269_v9  ;;  %699 = vperm.xlu2 %1179, %v347_v3   ;;  %v1494_v3 = vperm.slane %v509_v47, 1  ;;  %v1540_v47 = vperm.slane %v712_v21, 3 }
  0x51   : > { %591 = vperm.xlu1 %1178, %v346_v8  }
  0x52   : > { %2003 = vst [vmem:[#allocation18_spill] sm:$0xff] %v1494_v3 }
  0x53   : > { %2007 = vst [vmem:[#allocation22_spill] sm:$0xff] %v1540_v47 }
  0x58   : > { %1181 = vset.pattern.permute.xlu2 %v1267_v4 }
  0x59   : > { %1180 = vset.pattern.permute.xlu1 %v1270_v12  ;;  %v1510_v12 = vperm.slane %v612_v58, 2 }
  0x5a   : > { %695 = vperm.xlu1 %1180, %v346_v8   ;;  %v1504_v8 = vperm.slane %v609_v55, 2  ;;  %v1548_v55 = vperm.slane %v716_v25, 3 }
  0x5c   : > { %2011 = vst [vmem:[#allocation26_spill] sm:$0xff] %v1548_v55 }
  0x74   : > { %v362_v13 = vpop.permute.xlu2 %361 }
  0x75   : > { %v1450_v43 = vmul.f32 %v1425_v30, %v362_v13  ;;  %v1458_v48 = vmul.f32 %v1427_v31, %v362_v13  ;;  %v1461_v49 = vmul.f32 %v1429_v32, %v362_v13  ;;  %v1464_v50 = vmul.f32 %v1431_v33, %v362_v13 }
  0x76   : > { %v1477_v60 = vmul.f32 %v1434_v35, %v362_v13  ;;  %v1486_v0 = vmul.f32 %v1436_v36, %v362_v13  ;;  %v1489_v1 = vmul.f32 %v1438_v37, %v362_v13  ;;  %v1492_v2 = vmul.f32 %v1440_v38, %v362_v13 }
  0x77   : > { %v1512_v13 = vperm.slane %v613_v59, 2 }
  0x7d   : > { %v1413_v19 = vpop.permute.xlu2 %446 }
  0x85   : > { %v1452_v44 = vpop.permute.xlu2 %356 }
  0x86   : > { %1998 = vst [vmem:[#allocation13_spill] sm:$0xff] %v1452_v44  ;;  %v402_v27 = vmul.f32 %v1425_v30, %v1452_v44  ;;  %v403_v28 = vmul.f32 %v1427_v31, %v1452_v44  ;;  %v404_v14 = vmul.f32 %v1429_v32, %v1452_v44  ;;  %v1530_v15 = vmul.f32 %v1431_v33, %v1452_v44 }
  0x88   : > { %2004 = vst [vmem:[#allocation19_spill] sm:$0xff] %v1530_v15 }
  0x8b   : > { %v1496_v4 = vpop.permute.xlu1 %451 }
  0x8c   : > { %v372_v9 = vpop.permute.xlu0 %371 }
  0x8d   : > { %v426_v16 = vmul.f32 %v1425_v30, %v372_v9  ;;  %v427_v34 = vmul.f32 %v1427_v31, %v372_v9  ;;  %v428_v17 = vmul.f32 %v1429_v32, %v372_v9  ;;  %v429_v42 = vmul.f32 %v1431_v33, %v372_v9 }
  0x8e   : > { %v430_v57 = vmul.f32 %v1434_v35, %v372_v9  ;;  %v431_v58 = vmul.f32 %v1436_v36, %v372_v9  ;;  %v432_v59 = vmul.f32 %v1438_v37, %v372_v9  ;;  %v433_v18 = vmul.f32 %v1440_v38, %v372_v9 }
  0x8f   : > { %v492_v29 = vpop.permute.xlu2 %491  ;;  %v478_v20 = vadd.f32 %v1496_v4, %v426_v16  ;;  %v479_v21 = vadd.f32 %v1496_v4, %v427_v34  ;;  %v480_v24 = vadd.f32 %v1496_v4, %v428_v17  ;;  %v481_v25 = vadd.f32 %v1496_v4, %v429_v42 }
  0x90   : > { %v1561_v26 = vmul.f32 %v1442_v39, %v492_v29  ;;  %v1564_v15 = vmul.f32 %v1444_v40, %v492_v29  ;;  %v1567_v56 = vmul.f32 %v1446_v41, %v492_v29  ;;  %v1570_v9 = vmul.f32 %v1466_v51, %v492_v29 }
  0x91   : > { %v1574_v34 = vmul.f32 %v1479_v61, %v492_v29  ;;  %v1577_v17 = vmul.f32 %v1481_v62, %v492_v29  ;;  %v1580_v42 = vmul.f32 %v1483_v63, %v492_v29  ;;  %v1587_v47 = vmul.f32 %v1494_v3, %v492_v29 }
  0x92   : > { %2013 = vst [vmem:[#allocation28_spill] sm:$0xff] %v1564_v15  ;;  %v482_v46 = vadd.f32 %v1496_v4, %v430_v57  ;;  %v483_v45 = vadd.f32 %v1496_v4, %v431_v58 }
  0x93   : > { %2014 = vst [vmem:[#allocation29_spill] sm:$0xff] %v1567_v56 }
  0x94   : > { %v367_v22 = vpop.permute.xlu0 %366  ;;  %v500_v23 = vpop.permute.xlu1 %499  ;;  %2015 = vst [vmem:[#allocation30_spill] sm:$0xff] %v1570_v9 }
  0x95   : > { %v418_v16 = vmul.f32 %v1425_v30, %v367_v22  ;;  %2016 = vst [vmem:[#allocation31_spill] sm:$0xff] %v1574_v34  ;;  %v419_v55 = vmul.f32 %v1427_v31, %v367_v22  ;;  %v420_v54 = vmul.f32 %v1429_v32, %v367_v22  ;;  %v421_v53 = vmul.f32 %v1431_v33, %v367_v22 }
  0x96   : > { %2017 = vst [vmem:[#allocation32_spill] sm:$0xff] %v1577_v17  ;;  %v422_v52 = vmul.f32 %v1434_v35, %v367_v22  ;;  %v423_v30 = vmul.f32 %v1436_v36, %v367_v22  ;;  %v550_v17 = vmul.f32 %v1442_v39, %v500_v23  ;;  %v484_v32 = vadd.f32 %v1496_v4, %v432_v59 }
  0x97   : > { %2018 = vst [vmem:[#allocation33_spill] sm:$0xff] %v1580_v42  ;;  %v551_v42 = vmul.f32 %v1444_v40, %v500_v23  ;;  %v485_v33 = vadd.f32 %v1496_v4, %v433_v18  ;;  %v470_v34 = vadd.f32 %v1413_v19, %v418_v16  ;;  %v552_v29 = vmul.f32 %v1446_v41, %v500_v23 }
  0x98   : > { %2019 = vst [vmem:[#allocation34_spill] sm:$0xff] %v1587_v47  ;;  %v1594_v31 = vpop.permute.xlu2 %436  ;;  %v424_v36 = vmul.f32 %v1438_v37, %v367_v22  ;;  %v425_v57 = vmul.f32 %v1440_v38, %v367_v22  ;;  %v471_v58 = vadd.f32 %v1413_v19, %v419_v55  ;;  %v472_v47 = vadd.f32 %v1413_v19, %v420_v54 }
  0x99   : > { %2020 = vst [vmem:[#allocation35_spill] sm:$0xff] %v1594_v31  ;;  %v473_v9 = vadd.f32 %v1413_v19, %v421_v53  ;;  %v474_v56 = vadd.f32 %v1413_v19, %v422_v52  ;;  %v1607_v59 = vadd.f32 %v1594_v31, %v402_v27  ;;  %v1610_v4 = vadd.f32 %v1594_v31, %v403_v28 }
  0x9a   : > { %v1613_v18 = vadd.f32 %v1594_v31, %v404_v14  ;;  %v475_v16 = vadd.f32 %v1413_v19, %v423_v30  ;;  %v553_v55 = vmul.f32 %v1466_v51, %v500_v23  ;;  %v554_v54 = vmul.f32 %v1479_v61, %v500_v23 }
  0x9b   : > { %2021 = vst [vmem:[#allocation36_spill] sm:$0xff] %v1607_v59  ;;  %v555_v53 = vmul.f32 %v1481_v62, %v500_v23  ;;  %v556_v52 = vmul.f32 %v1483_v63, %v500_v23  ;;  %v476_v27 = vadd.f32 %v1413_v19, %v424_v36  ;;  %v477_v28 = vadd.f32 %v1413_v19, %v425_v57 }
  0x9c   : > { %2022 = vst [vmem:[#allocation37_spill] sm:$0xff] %v1610_v4  ;;  %v557_v14 = vmul.f32 %v1494_v3, %v500_v23  ;;  %v1629_v59 = vadd.f32 %v551_v42, %v479_v21  ;;  %v1631_v31 = vadd.f32 %v552_v29, %v480_v24  ;;  %v1637_v23 = vadd.f32 %v553_v55, %v481_v25 }
  0x9d   : > { %2023 = vst [vmem:[#allocation38_spill] sm:$0xff] %v1613_v18  ;;  %v496_v22 = vpop.permute.xlu0 %495  ;;  %v1625_v18 = vadd.f32 %v550_v17, %v478_v20  ;;  %v1639_v20 = vadd.f32 %v554_v54, %v482_v46  ;;  %v1641_v17 = vadd.f32 %v555_v53, %v483_v45  ;;  %v1657_v25 = vmul.f32 %v1434_v35, %v1452_v44 }
  0x9e   : > { %v1620_v38 = vpop.permute.xlu1 %603  ;;  %v542_v30 = vmul.f32 %v1442_v39, %v496_v22  ;;  %v543_v4 = vmul.f32 %v1444_v40, %v496_v22  ;;  %v544_v37 = vmul.f32 %v1446_v41, %v496_v22  ;;  %v545_v15 = vmul.f32 %v1466_v51, %v496_v22  ;;  %v2032_v51 = vld [vmem:[#allocation30_spill] sm:$0xff] }
  0x9f   : > { %v546_v36 = vmul.f32 %v1479_v61, %v496_v22  ;;  %v547_v19 = vmul.f32 %v1481_v62, %v496_v22  ;;  %2024 = vst [vmem:[#allocation39_spill] sm:$0xff] %v1639_v20  ;;  %v1643_v40 = vadd.f32 %v556_v52, %v484_v32  ;;  %v1647_v21 = vmul.f32 %v1498_v5, %v1620_v38  ;;  %v2030_v62 = vld [vmem:[#allocation28_spill] sm:$0xff]  ;;  %v2031_v61 = vld [vmem:[#allocation29_spill] sm:$0xff] }
  0xa0   : > { %2025 = vst [vmem:[#allocation40_spill] sm:$0xff] %v1641_v17  ;;  %v1651_v24 = vmul.f32 %v1500_v6, %v1620_v38  ;;  %v1653_v42 = vadd.f32 %v557_v14, %v485_v33  ;;  %v548_v46 = vmul.f32 %v1483_v63, %v496_v22  ;;  %v549_v45 = vmul.f32 %v1494_v3, %v496_v22  ;;  %v2042_v17 = vld [vmem:[#allocation23_spill] sm:$0xff]  ;;  %v2043_v20 = vld [vmem:[#allocation24_spill] sm:$0xff] }
  0xa1   : > { %v596_v57 = vpop.permute.xlu2 %595  ;;  %2026 = vst [vmem:[#allocation41_spill] sm:$0xff] %v1643_v40  ;;  %v1661_v32 = vadd.f32 %v542_v30, %v470_v34  ;;  %v1663_v29 = vadd.f32 %v543_v4, %v471_v58  ;;  %v1665_v55 = vadd.f32 %v544_v37, %v472_v47  ;;  %v1667_v54 = vadd.f32 %v545_v15, %v473_v9 }
  0xa2   : > { %2027 = vst [vmem:[#allocation42_spill] sm:$0xff] %v1653_v42  ;;  %v1669_v53 = vadd.f32 %v546_v36, %v474_v56  ;;  %v1671_v33 = vadd.f32 %v547_v19, %v475_v16  ;;  %v638_v52 = vmul.f32 %v1498_v5, %v596_v57  ;;  %v639_v35 = vmul.f32 %v1500_v6, %v596_v57  ;;  %v2041_v42 = vld [vmem:[#allocation22_spill] sm:$0xff] }
  0xa3   : > { %2028 = vst [vmem:[#allocation43_spill] sm:$0xff] %v1657_v25  ;;  %v640_v14 = vmul.f32 %v1502_v7, %v596_v57  ;;  %v641_v22 = vmul.f32 %v1504_v8, %v596_v57  ;;  %v642_v34 = vmul.f32 %v1506_v10, %v596_v57  ;;  %v643_v58 = vmul.f32 %v1508_v11, %v596_v57 }
  0xa4   : > { %v644_v37 = vmul.f32 %v1510_v12, %v596_v57  ;;  %v645_v15 = vmul.f32 %v1512_v13, %v596_v57  ;;  %v1681_v56 = vadd.f32 %v548_v46, %v476_v27  ;;  %v1683_v9 = vadd.f32 %v549_v45, %v477_v28 }
  0xa5   : > { %v656_v4 = vmul.f32 %v1502_v7, %v1620_v38  ;;  %v657_v16 = vmul.f32 %v1504_v8, %v1620_v38 }
  0xa6   : > { %2029 = vst [vmem:[#allocation44_spill] sm:$0xff] %v1683_v9  ;;  %v1697_v45 = vpop.permute.xlu0 %599  ;;  %v2044_v9 = vld [vmem:[#allocation25_spill] sm:$0xff] }
  0xa7   : > { %v442_v47 = vpop.permute.xlu1 %441 }
  0xa8   : > { %v462_v30 = vadd.f32 %v442_v47, %v1450_v43  ;;  %v463_v36 = vadd.f32 %v442_v47, %v1458_v48  ;;  %v464_v19 = vadd.f32 %v442_v47, %v1461_v49  ;;  %v465_v3 = vadd.f32 %v442_v47, %v1464_v50  ;;  %v2033_v50 = vld [vmem:[#allocation31_spill] sm:$0xff] }
  0xa9   : > { %v466_v57 = vadd.f32 %v442_v47, %v1477_v60  ;;  %v467_v27 = vadd.f32 %v442_v47, %v1486_v0  ;;  %v468_v28 = vadd.f32 %v442_v47, %v1489_v1  ;;  %v469_v46 = vadd.f32 %v442_v47, %v1492_v2  ;;  %v2034_v60 = vld [vmem:[#allocation32_spill] sm:$0xff]  ;;  %v2037_v2 = vld [vmem:[#allocation33_spill] sm:$0xff] }
  0xaa   : > { %v566_v63 = vadd.f32 %v1561_v26, %v462_v30  ;;  %v567_v43 = vadd.f32 %v2030_v62, %v463_v36  ;;  %v568_v48 = vadd.f32 %v2031_v61, %v464_v19  ;;  %v569_v49 = vadd.f32 %v2032_v51, %v465_v3  ;;  %v700_v25 = vpop.permute.xlu2 %699  ;;  %v2038_v30 = vld [vmem:[#allocation34_spill] sm:$0xff] }
  0xab   : > { %v570_v41 = vadd.f32 %v2033_v50, %v466_v57  ;;  %v571_v44 = vadd.f32 %v2034_v60, %v467_v27  ;;  %v1707_v0 = vmul.f32 %v1506_v10, %v1620_v38  ;;  %v1711_v1 = vmul.f32 %v1508_v11, %v1620_v38  ;;  %v2039_v57 = vld [vmem:[#allocation20_spill] sm:$0xff]  ;;  %v2040_v50 = vld [vmem:[#allocation21_spill] sm:$0xff] }
  0xac   : > { %v572_v26 = vadd.f32 %v2037_v2, %v468_v28  ;;  %v670_v62 = vadd.f32 %v638_v52, %v566_v63  ;;  %v671_v47 = vadd.f32 %v639_v35, %v567_v43  ;;  %v672_v61 = vadd.f32 %v640_v14, %v568_v48 }
  0xad   : > { %2035 = vst [vmem:[#allocation28_spill] sm:$0xff] %v1707_v0  ;;  %v573_v51 = vadd.f32 %v2038_v30, %v469_v46  ;;  %v673_v3 = vadd.f32 %v641_v22, %v569_v49  ;;  %v674_v36 = vadd.f32 %v642_v34, %v570_v41  ;;  %v675_v19 = vadd.f32 %v643_v58, %v571_v44  ;;  %v2046_v34 = vld [vmem:[#allocation26_spill] sm:$0xff]  ;;  %v2047_v46 = vld [vmem:[#allocation27_spill] sm:$0xff] }
  0xae   : > { %2036 = vst [vmem:[#allocation29_spill] sm:$0xff] %v1711_v1  ;;  %v742_v27 = vmul.f32 %v2039_v57, %v700_v25  ;;  %v743_v60 = vmul.f32 %v2040_v50, %v700_v25  ;;  %v744_v40 = vmul.f32 %v2041_v42, %v700_v25  ;;  %v745_v0 = vmul.f32 %v2042_v17, %v700_v25 }
  0xaf   : > { %v746_v1 = vmul.f32 %v2043_v20, %v700_v25  ;;  %v747_v28 = vmul.f32 %v2044_v9, %v700_v25  ;;  %v1723_v63 = vmul.f32 %v1510_v12, %v1620_v38  ;;  %v1727_v41 = vmul.f32 %v1512_v13, %v1620_v38 }
  0xb0   : > { %v676_v44 = vadd.f32 %v644_v37, %v572_v26  ;;  %v774_v52 = vadd.f32 %v742_v27, %v670_v62  ;;  %v775_v35 = vadd.f32 %v743_v60, %v671_v47  ;;  %v776_v14 = vadd.f32 %v744_v40, %v672_v61 }
  0xb1   : > { %2045 = vst [vmem:[#allocation30_spill] sm:$0xff] %v1723_v63  ;;  %v677_v22 = vadd.f32 %v645_v15, %v573_v51  ;;  %v748_v58 = vmul.f32 %v2046_v34, %v700_v25  ;;  %v749_v43 = vmul.f32 %v2047_v46, %v700_v25  ;;  %v777_v48 = vadd.f32 %v745_v0, %v673_v3  ;;  %v1731_v49 = vpop.permute.xlu1 %707  ;;  %v704_v0 = vpop.permute.xlu0 %703 }
  0xb2   : > { %v778_v2 = vadd.f32 %v746_v1, %v674_v36  ;;  %v779_v30 = vadd.f32 %v747_v28, %v675_v19  ;;  %v806_v39 = vmax.f32 %v774_v52, 0.0  ;;  %v807_v63 = vmax.f32 %v775_v35, 0.0 }
  0xb3   : > { %v646_v38 = vmul.f32 %v1498_v5, %v1697_v45  ;;  %v1737_v37 = vadd.f32 %v1647_v21, %v1625_v18  ;;  %v1741_v40 = vadd.f32 %v1651_v24, %v1629_v59  ;;  %v1744_v25 = vadd.f32 %v656_v4, %v1631_v31 }
  0xb4   : > { %v647_v15 = vmul.f32 %v1500_v6, %v1697_v45  ;;  %v808_v1 = vmax.f32 %v776_v14, 0.0  ;;  %v843_v26 = vadd.f32 %v807_v63, %v806_v39  ;;  %v1749_v62 = vadd.f32 %v657_v16, %v1637_v23 }
  0xb5   : > { %v780_v47 = vadd.f32 %v748_v58, %v676_v44  ;;  %v781_v61 = vadd.f32 %v749_v43, %v677_v22  ;;  %v648_v18 = vmul.f32 %v1502_v7, %v1697_v45  ;;  %v649_v59 = vmul.f32 %v1504_v8, %v1697_v45 }
  0xb6   : > { %v809_v21 = vmax.f32 %v777_v48, 0.0  ;;  %v810_v31 = vmax.f32 %v778_v2, 0.0  ;;  %v811_v24 = vmax.f32 %v779_v30, 0.0  ;;  %v844_v4 = vadd.f32 %v843_v26, %v808_v1 }
  0xb7   : > { %v650_v51 = vmul.f32 %v1506_v10, %v1697_v45  ;;  %v678_v39 = vadd.f32 %v646_v38, %v1661_v32  ;;  %v750_v23 = vmul.f32 %v2039_v57, %v704_v0  ;;  %v751_v16 = vmul.f32 %v2040_v50, %v704_v0 }
  0xb8   : > { %v845_v3 = vadd.f32 %v844_v4, %v809_v21  ;;  %v679_v36 = vadd.f32 %v647_v15, %v1663_v29  ;;  %v752_v19 = vmul.f32 %v2041_v42, %v704_v0  ;;  %v753_v27 = vmul.f32 %v2042_v17, %v704_v0 }
  0xb9   : > { %v651_v60 = vmul.f32 %v1508_v11, %v1697_v45  ;;  %v652_v28 = vmul.f32 %v1510_v12, %v1697_v45  ;;  %v680_v63 = vadd.f32 %v648_v18, %v1665_v55  ;;  %v782_v32 = vadd.f32 %v750_v23, %v678_v39 }
  0xba   : > { %v846_v44 = vadd.f32 %v845_v3, %v810_v31  ;;  %v681_v52 = vadd.f32 %v649_v59, %v1667_v54  ;;  %v754_v35 = vmul.f32 %v2043_v20, %v704_v0  ;;  %v783_v14 = vadd.f32 %v751_v16, %v679_v36  ;;  %v1772_v48 = vpop.permute.xlu1 %487  ;;  %v2048_v59 = vld [vmem:[#allocation10_spill] sm:$0xff]  ;;  %v2050_v36 = vld [vmem:[#allocation11_spill] sm:$0xff] }
  0xbb   : > { %v812_v29 = vmax.f32 %v780_v47, 0.0  ;;  %v813_v22 = vmax.f32 %v781_v61, 0.0  ;;  %v653_v58 = vmul.f32 %v1512_v13, %v1697_v45  ;;  %v784_v43 = vadd.f32 %v752_v19, %v680_v63 }
  0xbc   : > { %v847_v2 = vadd.f32 %v846_v44, %v811_v24  ;;  %v682_v30 = vadd.f32 %v650_v51, %v1669_v53  ;;  %v755_v55 = vmul.f32 %v2044_v9, %v704_v0  ;;  %v785_v38 = vadd.f32 %v753_v27, %v681_v52  ;;  %v2049_v53 = vld [vmem:[#allocation44_spill] sm:$0xff] }
  0xbd   : > { %v683_v15 = vadd.f32 %v651_v60, %v1671_v33  ;;  %v684_v54 = vadd.f32 %v652_v28, %v1681_v56  ;;  %v814_v1 = vmax.f32 %v782_v32, 0.0  ;;  %v815_v26 = vmax.f32 %v783_v14, 0.0 }
  0xbe   : > { %v848_v47 = vadd.f32 %v847_v2, %v812_v29  ;;  %v756_v61 = vmul.f32 %v2046_v34, %v704_v0  ;;  %v757_v45 = vmul.f32 %v2047_v46, %v704_v0  ;;  %v786_v18 = vadd.f32 %v754_v35, %v682_v30  ;;  %v2052_v2 = vld [vmem:[#allocation28_spill] sm:$0xff] }
  0xbf   : > { %v1782_v21 = vmul.f32 %v2048_v59, %v1772_v48  ;;  %v685_v31 = vadd.f32 %v653_v58, %v2049_v53  ;;  %v816_v24 = vmax.f32 %v784_v43, 0.0  ;;  %v852_v4 = vadd.f32 %v815_v26, %v814_v1  ;;  %v2051_v43 = vld [vmem:[#allocation39_spill] sm:$0xff]  ;;  %v2055_v1 = vld [vmem:[#allocation41_spill] sm:$0xff]  ;;  %v2056_v26 = vld [vmem:[#allocation30_spill] sm:$0xff] }
  0xc0   : > { %v849_v51 = vadd.f32 %v848_v47, %v813_v22  ;;  %v787_v33 = vadd.f32 %v755_v55, %v683_v15  ;;  %v817_v39 = vmax.f32 %v785_v38, 0.0  ;;  %v758_v56 = vmul.f32 %v2039_v57, %v1731_v49  ;;  %v2054_v15 = vld [vmem:[#allocation29_spill] sm:$0xff]  ;;  %v2057_v59 = vld [vmem:[#allocation42_spill] sm:$0xff] }
  0xc1   : > { %v853_v23 = vadd.f32 %v852_v4, %v816_v24  ;;  %v759_v16 = vmul.f32 %v2040_v50, %v1731_v49  ;;  %v760_v0 = vmul.f32 %v2041_v42, %v1731_v49  ;;  %v761_v3 = vmul.f32 %v2042_v17, %v1731_v49 }
  0xc2   : > { %v527_v19 = vmul.f32 %v2050_v36, %v1772_v48  ;;  %850 = vadd.xlane.f32.xlu1 %v849_v51  ;;  %v788_v27 = vadd.f32 %v756_v61, %v684_v54  ;;  %v789_v60 = vadd.f32 %v757_v45, %v685_v31  ;;  %v818_v28 = vmax.f32 %v786_v18, 0.0  ;;  %v2060_v36 = vld [vmem:[#allocation8_spill] sm:$0xff] }
  0xc3   : > { %v854_v63 = vadd.f32 %v853_v23, %v817_v39  ;;  %v762_v32 = vmul.f32 %v2043_v20, %v1731_v49  ;;  %v790_v44 = vadd.f32 %v758_v56, %v1737_v37  ;;  %v791_v52 = vadd.f32 %v759_v16, %v1741_v40  ;;  %v1809_v38 = vpop.permute.xlu1 %591  ;;  %v2053_v40 = vld [vmem:[#allocation40_spill] sm:$0xff]  ;;  %v2058_v16 = vld [vmem:[#allocation13_spill] sm:$0xff] }
  0xc4   : > { %v819_v35 = vmax.f32 %v787_v33, 0.0  ;;  %v763_v14 = vmul.f32 %v2044_v9, %v1731_v49  ;;  %v764_v29 = vmul.f32 %v2046_v34, %v1731_v49  ;;  %v792_v22 = vadd.f32 %v760_v0, %v1744_v25  ;;  %v2059_v0 = vld [vmem:[#allocation7_spill] sm:$0xff] }
  0xc5   : > { %v855_v58 = vadd.f32 %v854_v63, %v818_v28  ;;  %v690_v30 = vadd.f32 %v2052_v2, %v2051_v43  ;;  %v765_v55 = vmul.f32 %v2047_v46, %v1731_v49  ;;  %v793_v37 = vadd.f32 %v761_v3, %v1749_v62  ;;  %v2061_v28 = vld [vmem:[#allocation9_spill] sm:$0xff]  ;;  %v2063_v43 = vld [vmem:[#allocation19_spill] sm:$0xff] }
  0xc6   : > { %v691_v54 = vadd.f32 %v2054_v15, %v2053_v40  ;;  %v692_v47 = vadd.f32 %v2056_v26, %v2055_v1  ;;  %v822_v61 = vmax.f32 %v790_v44, 0.0  ;;  %v823_v45 = vmax.f32 %v791_v52, 0.0  ;;  %v2064_v2 = vld [vmem:[#allocation35_spill] sm:$0xff]  ;;  %v2066_v40 = vld [vmem:[#allocation14_spill] sm:$0xff] }
  0xc7   : > { %v820_v25 = vmax.f32 %v788_v27, 0.0  ;;  %v856_v18 = vadd.f32 %v855_v58, %v819_v35  ;;  %v693_v53 = vadd.f32 %v1727_v41, %v2057_v59  ;;  %v794_v31 = vadd.f32 %v762_v32, %v690_v30  ;;  %v2062_v41 = vld [vmem:[#allocation12_spill] sm:$0xff]  ;;  %v2067_v26 = vld [vmem:[#allocation15_spill] sm:$0xff] }
  0xc8   : > { %v795_v24 = vadd.f32 %v763_v14, %v691_v54  ;;  %v796_v49 = vadd.f32 %v764_v29, %v692_v47  ;;  %v824_v4 = vmax.f32 %v792_v22, 0.0  ;;  %v861_v62 = vadd.f32 %v823_v45, %v822_v61  ;;  %v2068_v61 = vld [vmem:[#allocation16_spill] sm:$0xff] }
  0xc9   : > { %v821_v51 = vmax.f32 %v789_v60, 0.0  ;;  %v857_v33 = vadd.f32 %v856_v18, %v820_v25  ;;  %v797_v39 = vadd.f32 %v765_v55, %v693_v53  ;;  %v825_v56 = vmax.f32 %v793_v37, 0.0  ;;  %v2065_v55 = vld [vmem:[#allocation43_spill] sm:$0xff]  ;;  %v2069_v25 = vld [vmem:[#allocation17_spill] sm:$0xff] }
  0xca   : > { %v862_v23 = vadd.f32 %v861_v62, %v824_v4  ;;  %v407_v3 = vmul.f32 %v2059_v0, %v2058_v16  ;;  %v408_v27 = vmul.f32 %v2060_v36, %v2058_v16  ;;  %v409_v63 = vmul.f32 %v2061_v28, %v2058_v16  ;;  %v2071_v4 = vld [vmem:[#allocation37_spill] sm:$0xff] }
  0xcb   : > { %v528_v32 = vmul.f32 %v2062_v41, %v1772_v48  ;;  %v630_v44 = vmul.f32 %v1498_v5, %v1809_v38  ;;  %v631_v60 = vmul.f32 %v1500_v6, %v1809_v38  ;;  %v858_v52 = vadd.f32 %v857_v33, %v821_v51  ;;  %v2072_v51 = vld [vmem:[#allocation38_spill] sm:$0xff] }
  0xcc   : > { %v826_v35 = vmax.f32 %v794_v31, 0.0  ;;  %v827_v14 = vmax.f32 %v795_v24, 0.0  ;;  %v828_v29 = vmax.f32 %v796_v49, 0.0  ;;  %v863_v22 = vadd.f32 %v862_v23, %v825_v56  ;;  %v696_v31 = vpop.permute.xlu1 %695  ;;  %v2070_v24 = vld [vmem:[#allocation36_spill] sm:$0xff] }
  0xcd   : > { %859 = vadd.xlane.f32.xlu0 %v858_v52  ;;  %v829_v58 = vmax.f32 %v797_v39, 0.0  ;;  %v457_v30 = vadd.f32 %v2064_v2, %v2063_v43  ;;  %v458_v37 = vadd.f32 %v2064_v2, %v2065_v55  ;;  %v529_v15 = vmul.f32 %v2066_v40, %v1772_v48  ;;  %v2073_v39 = vld [vmem:[#allocation18_spill] sm:$0xff] }
  0xce   : > { %v864_v5 = vadd.f32 %v863_v22, %v826_v35  ;;  %v459_v54 = vadd.f32 %v2064_v2, %v407_v3  ;;  %v460_v6 = vadd.f32 %v2064_v2, %v408_v27  ;;  %v461_v1 = vadd.f32 %v2064_v2, %v409_v63 }
  0xcf   : > { %v530_v47 = vmul.f32 %v2067_v26, %v1772_v48  ;;  %v531_v45 = vmul.f32 %v2068_v61, %v1772_v48  ;;  %v532_v18 = vmul.f32 %v2069_v25, %v1772_v48  ;;  %v632_v59 = vmul.f32 %v1502_v7, %v1809_v38 }
  0xd0   : > { %v865_v53 = vadd.f32 %v864_v5, %v827_v14  ;;  %v558_v49 = vadd.f32 %v1782_v21, %v2070_v24  ;;  %v559_v62 = vadd.f32 %v527_v19, %v2071_v4  ;;  %v560_v33 = vadd.f32 %v528_v32, %v2072_v51 }
  0xd1   : > { %v533_v56 = vmul.f32 %v2073_v39, %v1772_v48  ;;  %v561_v23 = vadd.f32 %v529_v15, %v457_v30  ;;  %v633_v16 = vmul.f32 %v1504_v8, %v1809_v38  ;;  %v634_v0 = vmul.f32 %v1506_v10, %v1809_v38 }
  0xd2   : > { %v866_v7 = vadd.f32 %v865_v53, %v828_v29  ;;  %v662_v3 = vadd.f32 %v630_v44, %v558_v49  ;;  %v663_v36 = vadd.f32 %v631_v60, %v559_v62  ;;  %v664_v27 = vadd.f32 %v632_v59, %v560_v33 }
  0xd3   : > { %v734_v21 = vmul.f32 %v2039_v57, %v696_v31  ;;  %v735_v19 = vmul.f32 %v2040_v50, %v696_v31  ;;  %v736_v28 = vmul.f32 %v2041_v42, %v696_v31  ;;  %v737_v63 = vmul.f32 %v2042_v17, %v696_v31 }
  0xd4   : > { %v867_v48 = vadd.f32 %v866_v7, %v829_v58  ;;  %v562_v41 = vadd.f32 %v530_v47, %v458_v37  ;;  %v635_v8 = vmul.f32 %v1508_v11, %v1809_v38  ;;  %v738_v32 = vmul.f32 %v2043_v20, %v696_v31 }
  0xd5   : > { %v665_v10 = vadd.f32 %v633_v16, %v561_v23  ;;  %v766_v52 = vadd.f32 %v734_v21, %v662_v3  ;;  %v767_v44 = vadd.f32 %v735_v19, %v663_v36  ;;  %v768_v60 = vadd.f32 %v736_v28, %v664_v27  ;;  %v892_v19 = vld [vmem:[%s1961_s3 + $0x10] sm:$0xff]  ;;  %v893_v28 = vld [vmem:[%s1961_s3 + $0x18] sm:$0xff] }
  0xd6   : > { %868 = vadd.xlane.f32.xlu2 %v867_v48  ;;  %v563_v35 = vadd.f32 %v531_v45, %v459_v54  ;;  %v564_v57 = vadd.f32 %v532_v18, %v460_v6  ;;  %v636_v50 = vmul.f32 %v1510_v12, %v1809_v38  ;;  %v666_v42 = vadd.f32 %v634_v0, %v562_v41  ;;  %v891_v48 = vld [vmem:[%s1961_s3 + $0x8] sm:$0xff]  ;;  %v894_v41 = vld [vmem:[%s1962_s4] sm:$0xff] }
  0xd7   : > { %v739_v17 = vmul.f32 %v2044_v9, %v696_v31  ;;  %v769_v14 = vadd.f32 %v737_v63, %v665_v10  ;;  %v798_v29 = vmax.f32 %v766_v52, 0.0  ;;  %v799_v22 = vmax.f32 %v767_v44, 0.0  ;;  %v890_v63 = vld [vmem:[%s1961_s3] sm:$0xff] }
  0xd8   : > { %v637_v11 = vmul.f32 %v1512_v13, %v1809_v38  ;;  %v667_v20 = vadd.f32 %v635_v8, %v563_v35  ;;  %v740_v58 = vmul.f32 %v2046_v34, %v696_v31  ;;  %v770_v43 = vadd.f32 %v738_v32, %v666_v42  ;;  %v895_v8 = vld [vmem:[%s1962_s4 + $0x8] sm:$0xff]  ;;  %v896_v42 = vld [vmem:[%s1962_s4 + $0x10] sm:$0xff] }
  0xd9   : > { %v800_v2 = vmax.f32 %v768_v60, 0.0  ;;  %v834_v30 = vadd.f32 %v799_v22, %v798_v29  ;;  %v565_v55 = vadd.f32 %v533_v56, %v461_v1  ;;  %v668_v37 = vadd.f32 %v636_v50, %v564_v57  ;;  %v944_v60 = vld [vmem:[%s1963_s5] sm:$0xff]  ;;  %v945_v35 = vld [vmem:[%s1963_s5 + $0x8] sm:$0xff] }
  0xda   : > { %v1271_v40 = vmov 0.0   ;;  %v741_v12 = vmul.f32 %v2047_v46, %v696_v31  ;;  %v771_v9 = vadd.f32 %v739_v17, %v667_v20  ;;  %v801_v15 = vmax.f32 %v769_v14, 0.0  ;;  %v897_v17 = vld [vmem:[%s1962_s4 + $0x18] sm:$0xff] }
  0xdb   : > { %339 = vst.msk [vmem:[#allocation2 + $0x8] sm:$0xff] %vm337_vm0, %v1271_v40  ;;  %v835_v5 = vadd.f32 %v834_v30, %v800_v2  ;;  %v669_v13 = vadd.f32 %v637_v11, %v565_v55  ;;  %v772_v34 = vadd.f32 %v740_v58, %v668_v37  ;;  %v802_v38 = vmax.f32 %v770_v43, 0.0  ;;  %v946_v30 = vld [vmem:[%s1963_s5 + $0x10] sm:$0xff]  ;;  %v947_v55 = vld [vmem:[%s1963_s5 + $0x18] sm:$0xff] }
  0xdc   : > { %338 = vst.msk [vmem:[#allocation2] sm:$0xff] %vm337_vm0, %v1271_v40  ;;  %v803_v1 = vmax.f32 %v771_v9, 0.0 }
  0xdd   : > { %340 = vst.msk [vmem:[#allocation2 + $0x10] sm:$0xff] %vm337_vm0, %v1271_v40  ;;  %v836_v54 = vadd.f32 %v835_v5, %v801_v15  ;;  %v773_v6 = vadd.f32 %v741_v12, %v669_v13  ;;  %v804_v47 = vmax.f32 %v772_v34, 0.0 }
  0xde   : > { %341 = vst.msk [vmem:[#allocation2 + $0x18] sm:$0xff] %vm337_vm0, %v1271_v40 }
  0xdf   : > { %v837_v26 = vadd.f32 %v836_v54, %v802_v38  ;;  %v805_v45 = vmax.f32 %v773_v6, 0.0 }
  0xe1   : > { %v838_v61 = vadd.f32 %v837_v26, %v803_v1 }
  0xe2   : > { %v831_v18 = vld [vmem:[#allocation2 + $0x8] sm:$0xff] }
  0xe3   : > { %v839_v46 = vadd.f32 %v838_v61, %v804_v47  ;;  %v830_v7 = vld [vmem:[#allocation2] sm:$0xff] }
  0xe4   : > { %v832_v31 = vld [vmem:[#allocation2 + $0x10] sm:$0xff]  ;;  %v965_v61 = vld [vmem:[#allocation3] sm:$0x1] }
  0xe5   : > { %v840_v25 = vadd.f32 %v839_v46, %v805_v45  ;;  %v833_v4 = vld [vmem:[#allocation2 + $0x18] sm:$0xff] }
  0xe7   : > { %841 = vadd.xlane.f32.xlu2 %v840_v25  ;;  %v967_v25 = vld [vmem:[%s1965_s7] sm:$0x1] }
 0x135   : > { %v851_v59 = vpop.xlane.xlu1 %850 }
 0x136   : > { %v871_v53 = vadd.f32 %v851_v59, %v831_v18 }
 0x138   : > { %876 = vst.msk [vmem:[#allocation2 + $0x8] sm:$0xff] %vm337_vm0, %v871_v53 }
 0x13f   : > { %v883_v23 = vld [vmem:[#allocation2 + $0x8] sm:$0xff] }
 0x140   : > { %v860_v24 = vpop.xlane.xlu0 %859  ;;  %v887_v0 = vmul.f32 0.0009765625, %v883_v23 }
 0x141   : > { %v872_v49 = vadd.f32 %v860_v24, %v832_v31 }
 0x143   : > { %877 = vst.msk [vmem:[#allocation2 + $0x10] sm:$0xff] %vm337_vm0, %v872_v49 }
 0x149   : > { %v869_v62 = vpop.xlane.xlu2 %868 }
 0x14a   : > { %v873_v51 = vadd.f32 %v869_v62, %v833_v4  ;;  %v884_v39 = vld [vmem:[#allocation2 + $0x10] sm:$0xff] }
 0x14b   : > { %v888_v16 = vmul.f32 0.0009765625, %v884_v39 }
 0x14c   : > { %878 = vst.msk [vmem:[#allocation2 + $0x18] sm:$0xff] %vm337_vm0, %v873_v51 }
 0x153   : > { %v885_v33 = vld [vmem:[#allocation2 + $0x18] sm:$0xff] }
 0x154   : > { %v889_v56 = vmul.f32 0.0009765625, %v885_v33 }
 0x156   : > { %923 = vmatpush.msra.mxu0 %v889_v56  ;;  %1092 = vmatpush.msra.mxu1 %v889_v56 }
 0x157   : > { %1093 = vmatpush.msra.mxu2 %v889_v56  ;;  %1094 = vmatpush.msra.mxu3 %v889_v56 }
 0x158   : > { %924 = vmatpush.msra.mxu0 %v888_v16  ;;  %1095 = vmatpush.msra.mxu1 %v888_v16 }
 0x159   : > { %1096 = vmatpush.msra.mxu2 %v888_v16  ;;  %1097 = vmatpush.msra.mxu3 %v888_v16 }
 0x15a   : > { %925 = vmatpush.msra.mxu0 %v887_v0  ;;  %1098 = vmatpush.msra.mxu1 %v887_v0  ;;  %v842_v3 = vpop.xlane.xlu2 %841 }
 0x15b   : > { %1099 = vmatpush.msra.mxu2 %v887_v0  ;;  %1100 = vmatpush.msra.mxu3 %v887_v0  ;;  %v870_v36 = vadd.f32 %v842_v3, %v830_v7 }
 0x15d   : > { %875 = vst.msk [vmem:[#allocation2] sm:$0xff] %vm337_vm0, %v870_v36 }
 0x164   : > { %v882_v27 = vld [vmem:[#allocation2] sm:$0xff] }
 0x165   : > { %v886_v21 = vmul.f32 0.0009765625, %v882_v27 }
 0x167   : > { %926 = vmatpush.msra.mxu0 %v886_v21  ;;  %1101 = vmatpush.msra.mxu1 %v886_v21 }
 0x168   : > { %1102 = vmatpush.msra.mxu2 %v886_v21  ;;  %1103 = vmatpush.msra.mxu3 %v886_v21 }
 0x169   : > { %1086 = vmatmul.msk.f32.vlgmr.msra.gmra.mxu2 %vm898_vm1, %v892_v19  ;;  %1087 = vmatmul.msk.f32.vlgmr.msra.gmra.mxu3 %vm898_vm1, %v893_v28 }
 0x16a   : > { %1084 = vmatmul.msk.f32.vlgmr.msra.gmra.mxu0 %vm898_vm1, %v890_v63  ;;  %1085 = vmatmul.msk.f32.vlgmr.msra.gmra.mxu1 %vm898_vm1, %v891_v48 }
 0x1e7   : > { %v928_v32 = vpop.f32.mrf.mxu0  ;;  %v931_v10 = vpop.f32.mrf.mxu1 }
 0x1e8   : > { %v929_v52 = vadd.f32 %v928_v32, %v894_v41  ;;  %v932_v44 = vadd.f32 %v931_v10, %v895_v8 }
 0x1ea   : > { %v940_v57 = vmax.f32 %v929_v52, 0.0  ;;  %v941_v50 = vmax.f32 %v932_v44, 0.0 }
 0x1ec   : > { %v948_v14 = vmul.f32 %v944_v60, %v940_v57  ;;  %v949_v29 = vmul.f32 %v945_v35, %v941_v50  ;;  %v934_v22 = vpop.f32.mrf.mxu2  ;;  %v937_v11 = vpop.f32.mrf.mxu3 }
 0x1ed   : > { %v935_v20 = vadd.f32 %v934_v22, %v896_v42  ;;  %v938_v58 = vadd.f32 %v937_v11, %v897_v17 }
 0x1ee   : > { %v952_v43 = vsel %vm337_vm0, %v948_v14, 0.0  ;;  %v953_v2 = vsel %vm337_vm0, %v949_v29, 0.0 }
 0x1ef   : > { %v942_v37 = vmax.f32 %v935_v20, 0.0  ;;  %v943_v40 = vmax.f32 %v938_v58, 0.0  ;;  %v954_v12 = vadd.f32 %v953_v2, %v952_v43 }
 0x1f1   : > { %v950_v9 = vmul.f32 %v946_v30, %v942_v37  ;;  %v951_v15 = vmul.f32 %v947_v55, %v943_v40 }
 0x1f3   : > { %v955_v5 = vsel %vm337_vm0, %v950_v9, 0.0  ;;  %v957_v13 = vsel %vm337_vm0, %v951_v15, 0.0 }
 0x1f4   : > { %v956_v34 = vadd.f32 %v955_v5, %v954_v12 }
 0x1f6   : > { %v958_v38 = vadd.f32 %v957_v13, %v956_v34 }
 0x1f8   : > { %v959_v54 = vrot.slane %v958_v38, 4 }
 0x1fa   : > { %v960_v6 = vadd.f32 %v959_v54, %v958_v38 }
 0x1fc   : > { %v961_v1 = vrot.slane %v960_v6, 2 }
 0x1fe   : > { %v962_v26 = vadd.f32 %v961_v1, %v960_v6 }
 0x200   : > { %v963_v47 = vrot.slane %v962_v26, 1 }
 0x202   : > { %v964_v45 = vadd.f32 %v963_v47, %v962_v26 }
 0x204   : > { %v966_v46 = vadd.f32 %v965_v61, %v964_v45 }
 0x206   : > { %970 = vperm.xlu2 %1181, %v966_v46  }
 0x260   : > { %v971_v18 = vpop.permute.xlu2 %970 }
 0x261   : > { %v973_v59 = vadd.f32 %v971_v18, %v967_v25 }
 0x263   : > { %v1088_v53 = vmul.f32 -1.442695, %v973_v59 }
 0x265   : > { %1183 = vpow2.f32 %v1088_v53 }
 0x26b   : > { %v1184_v31 = vpop.eup %1183 }
 0x26c   : > { %v977_v24 = vadd.f32 1.0, %v1184_v31 }
 0x26e   : > { %1185 = vrcp.f32 %v977_v24  ;;  %v989_v51 = vand.u32 2147483648, %v977_v24  ;;  %v987_v39 = vand.u32 2147483647, %v977_v24  ;;  %vm983_vm3 = vweird.f32 %v977_v24 }
 0x270   : > { %v990_v23 = vor.u32 1.1754944e-38, %v989_v51  ;;  %vm988_vm6 = vcmp.eq.f32.partialorder %v987_v39, 8.507059e+37 }
 0x274   : > { %v1186_v49 = vpop.eup %1185 }
 0x275   : > { %v979_v4 = vmul.f32 %v1186_v49, %v977_v24  ;;  %vm984_vm2 = vweird.f32 %v1186_v49 }
 0x276   : > { %vm985_vm4 = vmor %vm983_vm3, %vm984_vm2 }
 0x277   : > { %v980_v62 = vsub.f32 1.0, %v979_v4 }
 0x279   : > { %v981_v33 = vmul.f32 %v1186_v49, %v980_v62 }
 0x27b   : > { %v982_v56 = vadd.f32 %v1186_v49, %v981_v33 }
 0x27d   : > { %v986_v16 = vsel %vm985_vm4, %v1186_v49, %v982_v56 }
 0x27e   : > { %v991_v0 = vsel %vm988_vm6, %v990_v23, %v986_v16 }
 0x27f   : > { %994 = vst.msk [vmem:[%s322_s17] sm:$0x1] %vm993_vm5, %v991_v0 }
 0x280   : > { %1214 = shalt.err (!%p1211_p5)
}
 0x281   : > { %1104 = dma.vmem_to_hbm [thread:$0]  (%p1360_p4), %s1007_s20, 16, %s1009_s21, %s996_s10  }
 0x282 PF: > { %p1110_p6 = scmp.ge.s32.totalorder %s1265_s12, 2  ;;  %s1020_s28 = sand.u32 1, %s1245_s29  }
 0x283   : > { %s1021_s13 = scalar_lea.sflag [#allocation5], %s1020_s28 }
 0x284   : > { %p1107_p7 = pnand %p1110_p6, %p1367_p8 }
 0x286   : > { %p1108_p9 = pneg %p1107_p7 }
 0x288   : > { %1240 = dma.done.wait (%p1108_p9), %s1021_s13, 16  }
 0x289   : > { %1242 = vsyncadd (%p1108_p9), %s1021_s13, 4294967280  ;;  %s23_s12 = sadd.s32 1, %s1265_s12   ;;  %s2074_s29 = smov %s1249_s30 }
 0x28a   : > { %p20_p10 = scmp.ge.s32.totalorder %s23_s12, 4   ;;  %s2075_s30 = smov %s1253_s9 }
 0x28b   : > { %s2076_s9 = smov %s1373_s19  ;;  %s2077_s10 = smov %s1261_s11 }
 0x28c   : > { %s2078_s11 = smov %s2080_s14  ;;  %22 = sbr.rel (!%p20_p10) target bundleno = 7 (0x7), region = 95 }
 0x291   :  { %1026 = vsyncpa [#allocation5], 1 }
 0x292   :  { %1028 = vsyncpa [#allocation5 + $0x1], 1 }

</bundles_post_ra>
